<compile_context>
chip_gen: v5e
topology: v5e:2x2
jax: 0.10.0
libtpu: 0.0.40
codegen_flags: <defaults>
</compile_context>

<pallas_src>
import math
from typing import NamedTuple, Tuple

import jax
import jax.numpy as jnp
from jax.experimental import pallas as pl
from jax.experimental.pallas import tpu as pltpu

_MIB = 1024 * 1024
_LANE = 128


def _round_up(x, m):
    return ((x + m - 1) // m) * m


def _nbytes(shape, dt):
    return math.prod(shape) * jnp.dtype(dt).itemsize


def _vmem_capacity_bytes(default=64 * _MIB):
    """Generation-aware VMEM capacity (v5e/v6e: 128 MiB; v7x: 64 MiB per TC)."""
    try:
        info = pltpu.get_tpu_info()
        cap = getattr(info, "vmem_capacity_bytes", None)
        if cap:
            return int(cap)
    except Exception:
        pass
    return default


def _resident_spec(shape):
    """BlockSpec for a constant (grid-invariant) block: single-buffered."""
    idx = lambda i: (0, 0)
    if hasattr(pl, "Buffered"):
        try:
            return pl.BlockSpec(shape, idx, pipeline_mode=pl.Buffered(buffer_count=1))
        except TypeError:
            pass
    return pl.BlockSpec(shape, idx)


def _pick_tile(dim, cands=(512, 256, 128)):
    for c in cands:
        if dim % c == 0:
            return c
    return dim


# ----------------------------------------------------------------------------
# Parameter pre-packing (run once, NOT per forward call)
# ----------------------------------------------------------------------------
class PreparedMLP(NamedTuple):
    weights: Tuple[jax.Array, ...]   # padded (K_p, N_p), compute dtype
    biases: Tuple[jax.Array, ...]    # padded (1,  N_p), f32
    dims: Tuple[int, ...]            # true feature sizes [in, h1, ..., out]
    pdims: Tuple[int, ...]           # lane-padded feature sizes
    param_dtype: object


def prepare_mlp_params(weights, biases, *, param_dtype=jnp.bfloat16,
                       lane_mult=_LANE):
    """Pad every feature dim to a multiple of 128 and cast weights once."""
    assert len(weights) == len(biases)
    dims = [weights[0].shape[0]] + [w.shape[1] for w in weights]
    pdims = [_round_up(d, lane_mult) for d in dims]

    pw, pb = [], []
    for i, (w, b) in enumerate(zip(weights, biases)):
        wp = jnp.pad(w.astype(param_dtype),
                     ((0, pdims[i] - w.shape[0]), (0, pdims[i + 1] - w.shape[1])))
        b2 = jnp.reshape(b, (1, -1)).astype(jnp.float32)
        bp = jnp.pad(b2, ((0, 0), (0, pdims[i + 1] - b2.shape[1])))
        pw.append(wp)
        pb.append(bp)
    return PreparedMLP(tuple(pw), tuple(pb), tuple(dims), tuple(pdims),
                       param_dtype)


# ----------------------------------------------------------------------------
# Fused whole-MLP kernel (weights resident in VMEM, batch streamed)
# ----------------------------------------------------------------------------
def _make_mlp_kernel(num_layers, compute_dtype):
    def kernel(*refs):
        # refs = (x_ref, w0, b0, ..., w_{L-1}, b_{L-1}, out_ref)
        x_ref = refs[0]
        out_ref = refs[-1]
        param_refs = refs[1:-1]

        h = x_ref[...]
        for i in range(num_layers):
            w = param_refs[2 * i][...]        # (K_p, N_p) compute dtype
            b = param_refs[2 * i + 1][...]    # (1,  N_p) f32
            acc = jnp.dot(h, w, preferred_element_type=jnp.float32)
            acc = acc + b
            if i < num_layers - 1:            # nn.Sequential pops the final ReLU
                acc = jnp.maximum(acc, 0.0)
                h = acc.astype(compute_dtype)
            else:
                h = acc
        out_ref[...] = h.astype(out_ref.dtype)

    return kernel


# ----------------------------------------------------------------------------
# Per-layer tiled fallback (grid over M/N/K, f32 accumulator scratch)
# ----------------------------------------------------------------------------
def _make_linear_kernel(apply_relu):
    def kernel(x_ref, w_ref, b_ref, o_ref, acc_ref):
        k = pl.program_id(2)

        @pl.when(k == 0)
        def _():
            acc_ref[...] = jnp.zeros_like(acc_ref)

        acc_ref[...] += jnp.dot(x_ref[...], w_ref[...],
                                preferred_element_type=jnp.float32)

        @pl.when(k == pl.num_programs(2) - 1)
        def _():
            r = acc_ref[...] + b_ref[...]
            if apply_relu:
                r = jnp.maximum(r, 0.0)
            o_ref[...] = r.astype(o_ref.dtype)

    return kernel


def _linear_layer(x_p, w_p, b_p, *, apply_relu, out_dtype, tm, vmem_limit):
    M, K = x_p.shape
    _, N = w_p.shape
    tk = _pick_tile(K)
    tn = _pick_tile(N)
    grid = (M // tm, N // tn, K // tk)
    return pl.pallas_call(
        _make_linear_kernel(apply_relu),
        out_shape=jax.ShapeDtypeStruct((M, N), out_dtype),
        grid_spec=pltpu.PrefetchScalarGridSpec(
            num_scalar_prefetch=0,
            grid=grid,
            in_specs=[pl.BlockSpec((tm, tk), lambda i, j, k: (i, k)),
                      pl.BlockSpec((tk, tn), lambda i, j, k: (k, j)),
                      pl.BlockSpec((1, tn), lambda i, j, k: (0, j))],
            out_specs=pl.BlockSpec((tm, tn), lambda i, j, k: (i, j)),
            scratch_shapes=[pltpu.VMEM((tm, tn), jnp.float32)]),
        compiler_params=pltpu.CompilerParams(
            dimension_semantics=("parallel", "parallel", "arbitrary"),
            vmem_limit_bytes=vmem_limit),
    )(x_p, w_p, b_p)


# ----------------------------------------------------------------------------
# Forward
# ----------------------------------------------------------------------------
def mlp_forward(x, prepared: PreparedMLP):
    """Fused MLP forward on pre-packed (padded, cast) parameters."""
    num_layers = len(prepared.weights)
    batch, input_size = x.shape
    assert input_size == prepared.dims[0]
    output_size = prepared.dims[-1]
    pdims = prepared.pdims
    param_dtype = prepared.param_dtype
    out_dtype = x.dtype

    # ---- generation-aware VMEM budget -------------------------------------
    vmem_cap = _vmem_capacity_bytes()
    vmem_limit = int(min(int(vmem_cap * 0.8), vmem_cap - 8 * _MIB))
    max_batch_tile = 512 if vmem_cap >= 96 * _MIB else 256

    # ---- balanced batch tiling ---------------------------------------------
    sub_mult = 16 if param_dtype == jnp.bfloat16 else 8
    padded_rows = _round_up(batch, sub_mult)
    num_tiles = pl.cdiv(padded_rows, max_batch_tile)
    # Give v7x's two TensorCores work once the batch is big enough; the extra
    # grid step is ~free on single-TC parts.
    if num_tiles == 1 and padded_rows >= 128:
        num_tiles = 2
    batch_tile = _round_up(pl.cdiv(padded_rows, num_tiles), sub_mult)
    padded_batch = num_tiles * batch_tile
    grid = (num_tiles,)

    xp = jnp.pad(x.astype(param_dtype),
                 ((0, padded_batch - batch), (0, pdims[0] - input_size)))

    # ---- VMEM estimate (params single-buffered + io blocks + act scratch) --
    param_bytes = (sum(_nbytes(w.shape, param_dtype) for w in prepared.weights)
                   + sum(_nbytes(b.shape, jnp.float32) for b in prepared.biases))
    if not hasattr(pl, "Buffered"):
        param_bytes *= 2                         # would be double-buffered
    x_block = _nbytes((batch_tile, pdims[0]), param_dtype)
    o_block = _nbytes((batch_tile, pdims[-1]), out_dtype)
    max_feat = max(pdims)
    act_bytes = batch_tile * max_feat * (4 + jnp.dtype(param_dtype).itemsize)
    vmem_est = param_bytes + 2 * (x_block + o_block) + act_bytes + 2 * _MIB

    if vmem_est > vmem_limit:
        # -------- fallback: per-layer tiled matmul (weights streamed) -------
        h = xp
        for i in range(num_layers):
            last = i == num_layers - 1
            h = _linear_layer(h, prepared.weights[i], prepared.biases[i],
                              apply_relu=not last,
                              out_dtype=out_dtype if last else param_dtype,
                              tm=batch_tile, vmem_limit=vmem_limit)
        return h[:batch, :output_size]

    # -------- fused path: whole network in one pallas_call ------------------
    in_specs = [pl.BlockSpec((batch_tile, pdims[0]), lambda i: (i, 0))]
    args = [xp]
    for wp, bp in zip(prepared.weights, prepared.biases):
        in_specs.append(_resident_spec(wp.shape))
        in_specs.append(_resident_spec(bp.shape))
        args.append(wp)
        args.append(bp)
    out_specs = pl.BlockSpec((batch_tile, pdims[-1]), lambda i: (i, 0))

    flops = 2 * padded_batch * sum(pdims[i] * pdims[i + 1]
                                   for i in range(num_layers))
    bytes_accessed = (_nbytes(xp.shape, param_dtype) + param_bytes
                      + _nbytes((padded_batch, pdims[-1]), out_dtype))
    cost = pl.CostEstimate(flops=flops, transcendentals=0,
                           bytes_accessed=bytes_accessed)

    out_padded = pl.pallas_call(
        _make_mlp_kernel(num_layers, param_dtype),
        out_shape=jax.ShapeDtypeStruct((padded_batch, pdims[-1]), out_dtype),
        grid_spec=pltpu.PrefetchScalarGridSpec(
            num_scalar_prefetch=0,
            grid=grid,
            in_specs=in_specs,
            out_specs=out_specs,
        ),
        compiler_params=pltpu.CompilerParams(
            dimension_semantics=("parallel",),   # batch tiles shard across TCs
            vmem_limit_bytes=vmem_limit,
        ),
        cost_estimate=cost,
    )(*args)

    return out_padded[:batch, :output_size]


def cross_entropy_loss(logits, labels):
    """Plain-JAX glue reproducing nn.CrossEntropyLoss (mean reduction)."""
    logits = logits.astype(jnp.float32)
    lse = jax.nn.logsumexp(logits, axis=-1)
    nll = lse - jnp.take_along_axis(logits, labels[:, None], axis=-1)[:, 0]
    return jnp.mean(nll)


def mlp_model_forward(x, prepared: PreparedMLP, labels=None):
    """Mirrors MLPModel.forward: returns outputs, or (outputs, loss)."""
    outputs = mlp_forward(x, prepared)
    if labels is not None:
        loss = cross_entropy_loss(outputs, labels)
        return outputs, loss
    return outputs


def _init_linear(key, fan_in, fan_out, dtype=jnp.float32):
    """Init matching PyTorch nn.Linear default (uniform +-1/sqrt(fan_in))."""
    kw, kb = jax.random.split(key)
    bound = 1.0 / float(jnp.sqrt(jnp.asarray(fan_in, dtype=jnp.float32)))
    # Stored as (in, out) so the kernel does h @ W (PyTorch stores (out, in)).
    w = jax.random.uniform(kw, (fan_in, fan_out), dtype, -bound, bound)
    b = jax.random.uniform(kb, (1, fan_out), dtype, -bound, bound)
    return w, b


if __name__ == "__main__":
    # Small shapes consistent with the module:
    #   MLPModel(input_size=32, hidden_sizes=[64, 48], output_size=16)
    input_size = 32
    hidden_sizes = [64, 48]
    output_size = 16
    batch = 16

    sizes = [input_size] + hidden_sizes + [output_size]

    key = jax.random.PRNGKey(0)
    key, xk = jax.random.split(key)
    x = jax.random.normal(xk, (batch, input_size), dtype=jnp.float32)

    weights, biases = [], []
    for i in range(len(sizes) - 1):
        key, lk = jax.random.split(key)
        w, b = _init_linear(lk, sizes[i], sizes[i + 1])
        weights.append(w)
        biases.append(b)

    # Pre-pack parameters ONCE (padding + bf16 cast happen outside the
    # per-call forward path).
    prepared = prepare_mlp_params(weights, biases, param_dtype=jnp.bfloat16)
    jax.block_until_ready(prepared.weights)

    # Forward pass without labels (returns logits).
    out = mlp_model_forward(x, prepared)
    out = jax.block_until_ready(out)

    # Forward pass with labels (returns (logits, loss)); CE loss is JAX glue.
    key, lk = jax.random.split(key)
    labels = jax.random.randint(lk, (batch,), 0, output_size)
    out2, loss = mlp_model_forward(x, prepared, labels=labels)
    jax.block_until_ready((out2, loss))

    # Reference 1: bf16-quantized operands with f32 accumulation (same compute
    # pattern as the kernel) -- should match tightly.
    def quant_ref(xv, ws, bs, dt):
        h = xv.astype(dt).astype(jnp.float32)
        for i, (w, b) in enumerate(zip(ws, bs)):
            h = h @ w.astype(dt).astype(jnp.float32) + jnp.reshape(b, (1, -1))
            if i < len(ws) - 1:
                h = jnp.maximum(h, 0.0).astype(dt).astype(jnp.float32)
        return h

    ref_q = quant_ref(x, weights, biases, jnp.bfloat16)
    assert out.shape == (batch, output_size)
    assert jnp.allclose(out, ref_q, atol=5e-3, rtol=5e-3), \
        "Pallas MLP mismatch vs bf16-quantized reference"

    # Reference 2: pure f32 reference, loose tolerance (bf16 storage is used
    # in the kernel for MXU throughput; accumulation stays f32).
    # TODO(synk): use prepare_mlp_params(..., param_dtype=jnp.float32) if
    # strict f32 parity with the PyTorch module is ever required.
    h = x
    for i, (w, b) in enumerate(zip(weights, biases)):
        h = h @ w + jnp.reshape(b, (1, -1))
        if i < len(weights) - 1:
            h = jnp.maximum(h, 0.0)
    assert jnp.allclose(out, h, atol=1e-1, rtol=1e-1), \
        "Pallas MLP far from f32 reference"

    print("KERNEL_OK")
</pallas_src>

<mosaic_0001>
module attributes {stable_mosaic.version = 11 : i64} {
  func.func @kernel(%arg0: i32, %arg1: memref<16x128xbf16, #tpu.memory_space<vmem>>, %arg2: memref<128x128xbf16, #tpu.memory_space<vmem>>, %arg3: memref<1x128xf32, #tpu.memory_space<vmem>>, %arg4: memref<128x128xbf16, #tpu.memory_space<vmem>>, %arg5: memref<1x128xf32, #tpu.memory_space<vmem>>, %arg6: memref<128x128xbf16, #tpu.memory_space<vmem>>, %arg7: memref<1x128xf32, #tpu.memory_space<vmem>>, %arg8: memref<16x128xf32, #tpu.memory_space<vmem>>) attributes {dimension_semantics = [#tpu.dimension_semantics<parallel>], iteration_bounds = array<i64: 1>, scalar_prefetch = 0 : i64, scratch_operands = 0 : i64, tpu.core_type = #tpu.core_type<tc>, window_params = [{transform_indices = @transform_0, window_bounds = array<i64: 16, 128>}, {pipeline_mode = #tpu.pipeline_mode<synchronous>, transform_indices = @transform_1, window_bounds = array<i64: 128, 128>}, {pipeline_mode = #tpu.pipeline_mode<synchronous>, transform_indices = @transform_2, window_bounds = array<i64: 1, 128>}, {pipeline_mode = #tpu.pipeline_mode<synchronous>, transform_indices = @transform_3, window_bounds = array<i64: 128, 128>}, {pipeline_mode = #tpu.pipeline_mode<synchronous>, transform_indices = @transform_4, window_bounds = array<i64: 1, 128>}, {pipeline_mode = #tpu.pipeline_mode<synchronous>, transform_indices = @transform_5, window_bounds = array<i64: 128, 128>}, {pipeline_mode = #tpu.pipeline_mode<synchronous>, transform_indices = @transform_6, window_bounds = array<i64: 1, 128>}, {transform_indices = @transform_7, window_bounds = array<i64: 16, 128>}]} {
    %c0 = arith.constant 0 : index
    %c0_0 = arith.constant 0 : index
    %0 = vector.load %arg1[%c0, %c0_0] : memref<16x128xbf16, #tpu.memory_space<vmem>>, vector<16x128xbf16>
    %c0_1 = arith.constant 0 : index
    %c0_2 = arith.constant 0 : index
    %1 = vector.load %arg2[%c0_1, %c0_2] : memref<128x128xbf16, #tpu.memory_space<vmem>>, vector<128x128xbf16>
    %c0_3 = arith.constant 0 : index
    %c0_4 = arith.constant 0 : index
    %2 = vector.load %arg3[%c0_3, %c0_4] : memref<1x128xf32, #tpu.memory_space<vmem>>, vector<1x128xf32>
    %cst = arith.constant dense<0.000000e+00> : vector<16x128xf32>
    %3 = tpu.matmul %0, %1, %cst {dimension_numbers = #tpu.dot_dimension_numbers<[1], [0], [0], [1], [0, 0, 1, 1], [], []>} : vector<16x128xbf16>, vector<128x128xbf16>, vector<16x128xf32> -> vector<16x128xf32>
    %4 = vector.broadcast %2 : vector<1x128xf32> to vector<16x128xf32>
    %5 = arith.addf %3, %4 : vector<16x128xf32>
    %cst_5 = arith.constant 0.000000e+00 : f32
    %6 = vector.broadcast %cst_5 : f32 to vector<16x128xf32>
    %7 = arith.maximumf %5, %6 : vector<16x128xf32>
    %8 = arith.truncf %7 : vector<16x128xf32> to vector<16x128xbf16>
    %c0_6 = arith.constant 0 : index
    %c0_7 = arith.constant 0 : index
    %9 = vector.load %arg4[%c0_6, %c0_7] : memref<128x128xbf16, #tpu.memory_space<vmem>>, vector<128x128xbf16>
    %c0_8 = arith.constant 0 : index
    %c0_9 = arith.constant 0 : index
    %10 = vector.load %arg5[%c0_8, %c0_9] : memref<1x128xf32, #tpu.memory_space<vmem>>, vector<1x128xf32>
    %cst_10 = arith.constant dense<0.000000e+00> : vector<16x128xf32>
    %11 = tpu.matmul %8, %9, %cst_10 {dimension_numbers = #tpu.dot_dimension_numbers<[1], [0], [0], [1], [0, 0, 1, 1], [], []>} : vector<16x128xbf16>, vector<128x128xbf16>, vector<16x128xf32> -> vector<16x128xf32>
    %12 = vector.broadcast %10 : vector<1x128xf32> to vector<16x128xf32>
    %13 = arith.addf %11, %12 : vector<16x128xf32>
    %cst_11 = arith.constant 0.000000e+00 : f32
    %14 = vector.broadcast %cst_11 : f32 to vector<16x128xf32>
    %15 = arith.maximumf %13, %14 : vector<16x128xf32>
    %16 = arith.truncf %15 : vector<16x128xf32> to vector<16x128xbf16>
    %c0_12 = arith.constant 0 : index
    %c0_13 = arith.constant 0 : index
    %17 = vector.load %arg6[%c0_12, %c0_13] : memref<128x128xbf16, #tpu.memory_space<vmem>>, vector<128x128xbf16>
    %c0_14 = arith.constant 0 : index
    %c0_15 = arith.constant 0 : index
    %18 = vector.load %arg7[%c0_14, %c0_15] : memref<1x128xf32, #tpu.memory_space<vmem>>, vector<1x128xf32>
    %cst_16 = arith.constant dense<0.000000e+00> : vector<16x128xf32>
    %19 = tpu.matmul %16, %17, %cst_16 {dimension_numbers = #tpu.dot_dimension_numbers<[1], [0], [0], [1], [0, 0, 1, 1], [], []>} : vector<16x128xbf16>, vector<128x128xbf16>, vector<16x128xf32> -> vector<16x128xf32>
    %20 = vector.broadcast %18 : vector<1x128xf32> to vector<16x128xf32>
    %21 = arith.addf %19, %20 : vector<16x128xf32>
    %c0_17 = arith.constant 0 : index
    %c0_18 = arith.constant 0 : index
    %22 = vector.load %arg8[%c0_17, %c0_18] : memref<16x128xf32, #tpu.memory_space<vmem>>, vector<16x128xf32>
    tpu.vector_store %arg8[%c0_17, %c0_18], %21 {strides = array<i32>} : memref<16x128xf32, #tpu.memory_space<vmem>>, vector<16x128xf32>,
    return
  }
  func.func @transform_0(%arg0: i32) -> (i32, i32) {
    %c0_i32 = arith.constant 0 : i32
    %c0_i32_0 = arith.constant 0 : i32
    return %arg0, %c0_i32 : i32, i32
  }
  func.func @transform_1(%arg0: i32) -> (i32, i32) {
    %c0_i32 = arith.constant 0 : i32
    %c0_i32_0 = arith.constant 0 : i32
    %c0_i32_1 = arith.constant 0 : i32
    return %c0_i32, %c0_i32_0 : i32, i32
  }
  func.func @transform_2(%arg0: i32) -> (i32, i32) {
    %c0_i32 = arith.constant 0 : i32
    %c0_i32_0 = arith.constant 0 : i32
    %c0_i32_1 = arith.constant 0 : i32
    return %c0_i32, %c0_i32_0 : i32, i32
  }
  func.func @transform_3(%arg0: i32) -> (i32, i32) {
    %c0_i32 = arith.constant 0 : i32
    %c0_i32_0 = arith.constant 0 : i32
    %c0_i32_1 = arith.constant 0 : i32
    return %c0_i32, %c0_i32_0 : i32, i32
  }
  func.func @transform_4(%arg0: i32) -> (i32, i32) {
    %c0_i32 = arith.constant 0 : i32
    %c0_i32_0 = arith.constant 0 : i32
    %c0_i32_1 = arith.constant 0 : i32
    return %c0_i32, %c0_i32_0 : i32, i32
  }
  func.func @transform_5(%arg0: i32) -> (i32, i32) {
    %c0_i32 = arith.constant 0 : i32
    %c0_i32_0 = arith.constant 0 : i32
    %c0_i32_1 = arith.constant 0 : i32
    return %c0_i32, %c0_i32_0 : i32, i32
  }
  func.func @transform_6(%arg0: i32) -> (i32, i32) {
    %c0_i32 = arith.constant 0 : i32
    %c0_i32_0 = arith.constant 0 : i32
    %c0_i32_1 = arith.constant 0 : i32
    return %c0_i32, %c0_i32_0 : i32, i32
  }
  func.func @transform_7(%arg0: i32) -> (i32, i32) {
    %c0_i32 = arith.constant 0 : i32
    %c0_i32_0 = arith.constant 0 : i32
    return %arg0, %c0_i32 : i32, i32
  }
}

</mosaic_0001>

<bundles_post_ra>
// kernel: tpu_custom_call.1
= control target key start
LH: loop header
LB: loop body
LE: loop exit
PB: predicated region body
PF: predicated region fallthrough
CT: control target
= control target key end

     0   :  { %12 = vsyncpa [#allocation3], 0  ;;  %s711_s0 = inlined_call_operand.hbm [shape: bf16[16,128], index: 0, kind: input, shape index: {}]   ;;  %s712_s1 = inlined_call_operand.hbm [shape: bf16[128,128], index: 1, kind: input, shape index: {}]   ;;  %s713_s2 = inlined_call_operand.vmem [shape: f32[1,128], index: 2, kind: input, shape index: {}]   ;;  %s714_s3 = inlined_call_operand.hbm [shape: bf16[128,128], index: 3, kind: input, shape index: {}]   ;;  %s715_s4 = inlined_call_operand.vmem [shape: f32[1,128], index: 4, kind: input, shape index: {}]   ;;  %s716_s5 = inlined_call_operand.hbm [shape: bf16[128,128], index: 5, kind: input, shape index: {}]   ;;  %s717_s6 = inlined_call_operand.vmem [shape: f32[1,128], index: 6, kind: input, shape index: {}]   ;;  %s718_s7 = inlined_call_operand.hbm [shape: f32[16,128], index: 7, kind: output, shape index: {}]  }
   0x1   :  { %13 = vsyncpa [#allocation6], 0 }
   0x2   :  { %14 = vsyncpa [#allocation9], 0 }
   0x3   :  { %15 = vsyncpa [#allocation4], 0  ;;  %s33_s26 = sshll.u32 %s712_s1, 4  ;;  %s638_s27 = smov [#allocation5]   ;;  %s34_s26 = int_to_ptr.hbm [resolvable:$true] %s33_s26 }
   0x4   :  { %s35_s28 = sshll.u32 %s638_s27, 4  ;;  %s20_s8 = sshll.u32 %s711_s0, 4  ;;  %s36_s28 = int_to_ptr.vmem [resolvable:$true] %s35_s28  ;;  %s21_s8 = int_to_ptr.hbm [resolvable:$true] %s20_s8 }
   0x5   :  { %s639_s9 = smov 64   ;;  %s640_s10 = smov 4  }
   0x6   :  { %41 = dma.hbm_to_vmem [thread:$0]  %s34_s26, 1024, %s36_s28, [#allocation6], %s639_s9, %s639_s9, %s640_s10  }
   0x7   :  { %s641_s11 = smov [#allocation2]   ;;  %s48_s15 = sshll.u32 %s714_s3, 4  ;;  %s49_s15 = int_to_ptr.hbm [resolvable:$true] %s48_s15 }
   0x8   :  { %s22_s12 = sshll.u32 %s641_s11, 4  ;;  %s63_s17 = sshll.u32 %s716_s5, 4  ;;  %s23_s12 = int_to_ptr.vmem [resolvable:$true] %s22_s12  ;;  %s64_s17 = int_to_ptr.hbm [resolvable:$true] %s63_s17 }
   0x9   :  { %28 = dma.hbm_to_vmem [thread:$0]  %s21_s8, 128, %s23_s12, [#allocation3], %s639_s9, %s639_s9, %s640_s10  }
   0xa   :  { %s642_s18 = smov [#allocation7]   ;;  %s643_s0 = smov [#allocation8]  }
   0xb   :  { %s50_s19 = sshll.u32 %s642_s18, 4  ;;  %s65_s20 = sshll.u32 %s643_s0, 4  ;;  %s51_s19 = int_to_ptr.vmem [resolvable:$true] %s50_s19  ;;  %s66_s20 = int_to_ptr.vmem [resolvable:$true] %s65_s20 }
   0xc   :  { %56 = dma.hbm_to_vmem [thread:$0]  %s49_s15, 1024, %s51_s19, [#allocation6], %s639_s9, %s639_s9, %s640_s10  }
   0xd   :  { %71 = dma.hbm_to_vmem [thread:$0]  %s64_s17, 1024, %s66_s20, [#allocation9], %s639_s9, %s639_s9, %s640_s10  }
   0xe   :  { %630 = dma.done.wait [#allocation3], 128  }
   0xf   :  { %631 = vsyncadd [#allocation3], 4294967168 }
  0x10   :  { %632 = dma.done.wait [#allocation6], 2048  }
  0x11   :  { %633 = vsyncadd [#allocation6], 4294965248 }
  0x12   :  { %634 = dma.done.wait [#allocation9], 1024  }
  0x13   :  { %635 = vsyncadd [#allocation9], 4294966272  ;;  %v481_v0 = vld [vmem:[#allocation5 + $0x38] sm:$0xff]  ;;  %v480_v1 = vld [vmem:[#allocation5 + $0x30] sm:$0xff]  ;;  %s644_s24 = smov [#allocation10]   ;;  %s645_s28 = smov 128  }
  0x14   :  { %166 = vmatpush.bf16.msra.mxu0 %v481_v0  ;;  %v489_v2 = vld [vmem:[#allocation7 + $0x38] sm:$0xff]  ;;  %v488_v3 = vld [vmem:[#allocation7 + $0x30] sm:$0xff]  ;;  %v479_v4 = vld [vmem:[#allocation5 + $0x28] sm:$0xff]  ;;  %s356_s25 = sshll.u32 %s644_s24, 4  ;;  %s646_s29 = smov 8   ;;  %s357_s25 = int_to_ptr.vmem [resolvable:$true] %s356_s25 }
  0x15   :  { %251 = vmatpush.bf16.msra.mxu1 %v489_v2  ;;  %v487_v5 = vld [vmem:[#allocation7 + $0x28] sm:$0xff]  ;;  %v478_v6 = vld [vmem:[#allocation5 + $0x20] sm:$0xff]  ;;  %v477_v8 = vld [vmem:[#allocation5 + $0x18] sm:$0xff] }
  0x16   :  { %v486_v7 = vld [vmem:[#allocation7 + $0x20] sm:$0xff]  ;;  %v476_v9 = vld [vmem:[#allocation5 + $0x10] sm:$0xff]  ;;  %v475_v10 = vld [vmem:[#allocation5 + $0x8] sm:$0xff] }
  0x17   :  { %v474_v11 = vld [vmem:[#allocation5] sm:$0xff]  ;;  %v473_v12 = vld [vmem:[#allocation2] sm:$0xff]  ;;  %v484_v14 = vld [vmem:[#allocation7 + $0x10] sm:$0xff] }
  0x18   :  { %167 = vmatpush.bf16.msra.mxu0 %v480_v1  ;;  %v485_v13 = vld [vmem:[#allocation7 + $0x18] sm:$0xff]  ;;  %v483_v15 = vld [vmem:[#allocation7 + $0x8] sm:$0xff]  ;;  %v482_v16 = vld [vmem:[#allocation7] sm:$0xff] }
  0x19   :  { %252 = vmatpush.bf16.msra.mxu1 %v488_v3  ;;  %v497_v17 = vld [vmem:[#allocation8 + $0x38] sm:$0xff]  ;;  %v496_v18 = vld [vmem:[#allocation8 + $0x30] sm:$0xff]  ;;  %v495_v19 = vld [vmem:[#allocation8 + $0x28] sm:$0xff] }
  0x1a   :  { %336 = vmatpush.bf16.msra.mxu2 %v497_v17  ;;  %v494_v20 = vld [vmem:[#allocation8 + $0x20] sm:$0xff]  ;;  %v507_v22 = vld [vmem:[%s713_s2] ss:$0 sm:$0xff]  ;;  %v492_v30 = vld [vmem:[#allocation8 + $0x10] sm:$0xff] }
  0x1b   :  { %v493_v29 = vld [vmem:[#allocation8 + $0x18] sm:$0xff]  ;;  %v491_v31 = vld [vmem:[#allocation8 + $0x8] sm:$0xff]  ;;  %v490_v32 = vld [vmem:[#allocation8] sm:$0xff] }
  0x1c   :  { %168 = vmatpush.bf16.msra.mxu0 %v479_v4  ;;  %v508_v34 = vld [vmem:[%s715_s4] ss:$0 sm:$0xff]  ;;  %s358_s4 = sshll.u32 %s718_s7, 4  ;;  %s359_s4 = int_to_ptr.hbm [resolvable:$true] %s358_s4 }
  0x1d   :  { %253 = vmatpush.bf16.msra.mxu1 %v487_v5  ;;  %v509_v41 = vld [vmem:[%s717_s6] ss:$0 sm:$0xff] }
  0x1e   :  { %337 = vmatpush.bf16.msra.mxu2 %v496_v18 }
  0x20   :  { %169 = vmatpush.bf16.msra.mxu0 %v478_v6 }
  0x21   :  { %254 = vmatpush.bf16.msra.mxu1 %v486_v7 }
  0x22   :  { %338 = vmatpush.bf16.msra.mxu2 %v495_v19 }
  0x24   :  { %170 = vmatpush.bf16.msra.mxu0 %v477_v8 }
  0x25   :  { %255 = vmatpush.bf16.msra.mxu1 %v485_v13 }
  0x26   :  { %339 = vmatpush.bf16.msra.mxu2 %v494_v20 }
  0x28   :  { %171 = vmatpush.bf16.msra.mxu0 %v476_v9 }
  0x29   :  { %256 = vmatpush.bf16.msra.mxu1 %v484_v14 }
  0x2a   :  { %340 = vmatpush.bf16.msra.mxu2 %v493_v29 }
  0x2c   :  { %172 = vmatpush.bf16.msra.mxu0 %v475_v10 }
  0x2d   :  { %257 = vmatpush.bf16.msra.mxu1 %v483_v15 }
  0x2e   :  { %341 = vmatpush.bf16.msra.mxu2 %v492_v30 }
  0x30   :  { %173 = vmatpush.bf16.msra.mxu0 %v474_v11 }
  0x31   :  { %258 = vmatpush.bf16.msra.mxu1 %v482_v16 }
  0x32   :  { %342 = vmatpush.bf16.msra.mxu2 %v491_v31 }
  0x33   :  { %174 = vmatmul.bf16.vlgmr.msra.gmra.mxu0 %v473_v12 }
  0x36   :  { %343 = vmatpush.bf16.msra.mxu2 %v490_v32 }
  0xb0   :  { %v175_v21 = vpop.f32.mrf.mxu0 }
  0xb1   :  { %v176_v23 = vadd.f32 %v507_v22, %v175_v21 }
  0xb3   :  { %v180_v26 = vmax.f32 %v176_v23, 0.0 }
  0xb8   :  { %v177_v24 = vpop.f32.mrf.mxu0 }
  0xb9   :  { %v178_v25 = vadd.f32 %v507_v22, %v177_v24 }
  0xbb   :  { %v181_v27 = vmax.f32 %v178_v25, 0.0 }
  0xbd   :  { %v182_v28 = vpack.c.bf16 %v181_v27, %v180_v26 }
  0xbf   :  { %259 = vmatmul.bf16.vlgmr.msra.gmra.mxu1 %v182_v28 }
 0x13c   :  { %v260_v33 = vpop.f32.mrf.mxu1 }
 0x13d   :  { %v261_v35 = vadd.f32 %v508_v34, %v260_v33 }
 0x13f   :  { %v265_v38 = vmax.f32 %v261_v35, 0.0 }
 0x144   :  { %v262_v36 = vpop.f32.mrf.mxu1 }
 0x145   :  { %v263_v37 = vadd.f32 %v508_v34, %v262_v36 }
 0x147   :  { %v266_v39 = vmax.f32 %v263_v37, 0.0 }
 0x149   :  { %v267_v40 = vpack.c.bf16 %v266_v39, %v265_v38 }
 0x14b   :  { %344 = vmatmul.bf16.vlgmr.msra.gmra.mxu2 %v267_v40 }
 0x1ce   :  { %v345_v42 = vpop.f32.mrf.mxu2 }
 0x1cf   :  { %v346_v43 = vadd.f32 %v509_v41, %v345_v42 }
 0x1d1   :  { %350 = vst [vmem:[#allocation10] sm:$0xff] %v346_v43 }
 0x1d6   :  { %v347_v44 = vpop.f32.mrf.mxu2 }
 0x1d7   :  { %v348_v45 = vadd.f32 %v509_v41, %v347_v44 }
 0x1d9   :  { %351 = vst [vmem:[#allocation10 + $0x8] sm:$0xff] %v348_v45 }
 0x1da   :  { %364 = dma.vmem_to_hbm [thread:$0]  %s357_s25, 256, %s359_s4, [#allocation4], %s645_s28, %s645_s28, %s646_s29  }
 0x1db   :  { %636 = dma.done.wait [#allocation4], 256  }
 0x1dc   :  { %637 = vsyncadd [#allocation4], 4294967040 }
 0x1dd   :  { %369 = vsyncpa [#allocation3], 1 }
 0x1de   :  { %370 = vsyncpa [#allocation6], 1 }
 0x1df   :  { %371 = vsyncpa [#allocation9], 1 }
 0x1e0   :  { %372 = vsyncpa [#allocation4], 1 }

</bundles_post_ra>
